<compile_context>
chip_gen: v7x
topology: tpu7x:2x2x1
jax: 0.10.0
libtpu: 0.0.40
codegen_flags: <defaults>
</compile_context>

<pallas_src>
import jax
import jax.numpy as jnp
from jax.experimental import pallas as pl
from jax.experimental.pallas import tpu as pltpu


_NEG_BIG = -1e30  # "minus infinity" that never produces inf/NaN through exp/max.


def _round_up(x, m):
    return (x + m - 1) // m * m


def _lane_pad(n):
    return _round_up(max(int(n), 1), 128)


def _sublane_pad(n):
    return _round_up(max(int(n), 1), 8)


def _make_kernel(B, T, block_b, block_t, nt):
    """Kernel closure. Grid = (batch blocks [parallel], T tiles [arbitrary])."""
    T_out = nt * block_t

    def kernel(vec_ref, mat_ref, len_ref, wvt_ref, wmt_ref, wa_ref,
               rep_ref, attn_ref, m_ref):
        i = pl.program_id(0)          # batch block
        j = pl.program_id(1)          # T tile (innermost, arbitrary)

        @pl.when(j == 0)
        def _init():
            m_ref[...] = jnp.full_like(m_ref, _NEG_BIG)
            rep_ref[...] = jnp.zeros_like(rep_ref)

        vec = vec_ref[...]            # (Bb, Dv)
        mat = mat_ref[...]            # (Bb, Tc, Dbid)
        lens = len_ref[...]           # (Bb, 1) int32
        wv_t = wvt_ref[...]           # (Dv, A)   pre-transposed, VMEM resident
        wm_t = wmt_ref[...]           # (Dbid, A) pre-transposed, VMEM resident
        wa = wa_ref[...]              # (1, A)

        Bb, Tc, Dbid = mat.shape
        A = wv_t.shape[1]

        # Validity masks: ragged batch tail (rows >= B) and ragged/padded T tail.
        row_ids = i * block_b + jax.lax.broadcasted_iota(jnp.int32, (Bb, 1), 0)
        row_valid = row_ids < B                                        # (Bb, 1)
        gpos = j * block_t + jax.lax.broadcasted_iota(jnp.int32, (Bb, Tc), 1)
        mask = (gpos < lens) & row_valid                               # (Bb, Tc)

        # t1 (tiny) and t2 on the MXU; both row-independent so tail garbage cannot
        # contaminate valid rows.
        t1 = jnp.dot(vec, wv_t, preferred_element_type=jnp.float32)    # (Bb, A)
        mat2 = mat.reshape(Bb * Tc, Dbid)   # view when Tc % 8 == 0 (we ensure)
        t2 = jnp.dot(mat2, wm_t, preferred_element_type=jnp.float32)
        t2 = t2.reshape(Bb, Tc, A)
        t3 = jnp.maximum(t1[:, None, :] + t2, 0.0)                     # (Bb, Tc, A)

        # N=1 attention projection as VPU multiply + lane reduce.
        logits = jnp.sum(t3 * wa[None], axis=-1)                       # (Bb, Tc)
        logits = jnp.where(mask, logits, _NEG_BIG)

        # Stage masked logits in the resident attention output block; overwritten
        # with the final probabilities at the last T tile.
        if nt == 1:
            attn_ref[...] = logits
        else:
            start = pl.multiple_of(j * block_t, block_t)               # 128-aligned
            attn_ref[:, pl.ds(start, block_t)] = logits

        # Online-softmax accumulation of the representation (rescale on max update).
        m_old = m_ref[...]                                             # (Bb, 1)
        m_new = jnp.maximum(m_old, jnp.max(logits, axis=1, keepdims=True))
        alpha = jnp.exp(m_old - m_new)
        p = jnp.where(mask, jnp.exp(logits - m_new), 0.0)              # (Bb, Tc)
        if T % block_t != 0:
            # Last T tile reads past T; keep possible NaN/inf garbage out of the
            # 0 * garbage products in the contraction below.
            mat = jnp.where((gpos < T)[:, :, None], mat, 0.0)
        contrib = jnp.einsum('bqt,btd->bqd', p[:, None, :], mat,
                             preferred_element_type=jnp.float32)[:, 0, :]
        rep_ref[...] = alpha * rep_ref[...] + contrib
        m_ref[...] = m_new

        @pl.when(j == nt - 1)
        def _finalize():
            stored = attn_ref[...]                                     # (Bb, T_out)
            m_fin = m_ref[...]                                         # (Bb, 1)
            pos = jax.lax.broadcasted_iota(jnp.int32, (Bb, T_out), 1)
            full_mask = (pos < lens) & row_valid
            unnorm = jnp.where(full_mask, jnp.exp(stored - m_fin), 0.0)
            denom = jnp.maximum(jnp.sum(unnorm, axis=1, keepdims=True), 1e-30)
            inv = 1.0 / denom                                          # exact
            attn_ref[...] = unnorm * inv
            rep_ref[...] = rep_ref[...] * inv

    return kernel


def attention_pair(vector, matrix, input_lengths, w_vec, w_mat, w_attn,
                   *, block_b=None, block_t=None, interpret=False):
    """vector (B, Dv) f32, matrix (B, T, Dbid) f32, input_lengths (B,) int.

    Weights in PyTorch nn.Linear layout: w_vec (A, Dv), w_mat (A, Dbid), w_attn (1, A).
    Returns (representations (B, Dbid), attentions (B, T)).
    """
    B, T, Dbid = matrix.shape
    Dv = vector.shape[1]
    A = w_vec.shape[0]

    vector = jnp.asarray(vector, jnp.float32)
    matrix = jnp.asarray(matrix, jnp.float32)        # NO pad copy of the big stream
    lens2d = jnp.asarray(input_lengths, jnp.int32).reshape(B, 1)
    wv_t = jnp.asarray(w_vec, jnp.float32).T          # (Dv, A)
    wm_t = jnp.asarray(w_mat, jnp.float32).T           # (Dbid, A)
    wa = jnp.asarray(w_attn, jnp.float32)               # (1, A)

    # ---- per-generation VMEM limit (v5e/v6e: 128 MiB phys, v7x: 64 MiB) ----
    try:
        vmem_cap = int(pltpu.get_tpu_info().vmem_capacity_bytes)
    except Exception:
        vmem_cap = 64 * 1024 * 1024
    vmem_limit = max(32 * 1024 * 1024, min((vmem_cap * 3) // 4, 112 * 1024 * 1024))
    budget = int(vmem_limit * 0.6)   # headroom for weights / compiler scratch

    # ---- T tiling (bounds intermediates and matrix block independent of T) ----
    if block_t is None:
        block_t = T if T <= 1024 else 512
    block_t = int(block_t)
    if block_t >= T:
        block_t = T
    else:
        block_t = min(_round_up(block_t, 128), _round_up(T, 128))
        if block_t >= T:
            block_t = T

    def per_row_bytes(bt, t_out):
        # lane/sublane-PADDED VMEM footprint per batch row (f32).
        return 4 * (2 * _sublane_pad(bt) * _lane_pad(Dbid)   # matrix block, dbl-buf
                    + 2 * _lane_pad(Dv)                      # vector block
                    + 2 * _lane_pad(t_out)                   # resident attn out block
                    + 2 * _lane_pad(Dbid)                    # rep out block
                    + 4 * _sublane_pad(bt) * _lane_pad(A)    # t2/t3/relu temporaries
                    + 6 * _lane_pad(bt)                      # logits/p/mask temps
                    + 3 * _lane_pad(t_out))                  # finalize temporaries

    while True:
        nt = -(-T // block_t)
        t_out = nt * block_t
        fit_b = int(budget // per_row_bytes(block_t, t_out)) // 8 * 8
        if fit_b >= 8 or block_t <= 128:
            break
        new_bt = max(128, ((block_t // 2 + 127) // 128) * 128)
        if new_bt >= block_t:
            break
        block_t = new_bt

    nt = -(-T // block_t)
    T_out = nt * block_t

    # ---- batch tiling ----
    if B < 8:
        block_b = B
    else:
        if block_b is None:
            block_b = max(8, int(fit_b))
        block_b = max(8, (int(block_b) // 8) * 8)
        if B >= 16:
            # keep several grid steps so ("parallel", ...) has work for both v7x TCs
            desired = 4 if B >= 32 else 2
            block_b = min(block_b, max(8, _round_up(-(-B // desired), 8)))
        block_b = min(block_b, (B // 8) * 8)     # never exceed the array extent
    nb = -(-B // block_b)

    cost = pl.CostEstimate(
        flops=int(2 * B * Dv * A + 2 * B * T * Dbid * A + 2 * B * T * A
                  + 2 * B * T * Dbid),
        transcendentals=int(2 * B * T + 4 * B * nt),
        bytes_accessed=int(4 * (B * Dv + B * T * Dbid + B + B * Dbid + B * T_out
                                + Dv * A + Dbid * A + A)),
    )

    kernel = _make_kernel(B, T, block_b, block_t, nt)

    rep, attn = pl.pallas_call(
        kernel,
        out_shape=(
            jax.ShapeDtypeStruct((B, Dbid), jnp.float32),    # representations
            jax.ShapeDtypeStruct((B, T_out), jnp.float32),   # attentions (T padded)
        ),
        grid_spec=pltpu.PrefetchScalarGridSpec(
            num_scalar_prefetch=0,
            grid=(nb, nt),
            in_specs=[
                pl.BlockSpec((block_b, Dv), lambda i, j: (i, 0)),          # vector
                pl.BlockSpec((block_b, block_t, Dbid), lambda i, j: (i, j, 0)),  # matrix
                pl.BlockSpec((block_b, 1), lambda i, j: (i, 0)),           # lengths
                pl.BlockSpec((Dv, A), lambda i, j: (0, 0)),                # wv_t
                pl.BlockSpec((Dbid, A), lambda i, j: (0, 0)),              # wm_t
                pl.BlockSpec((1, A), lambda i, j: (0, 0)),                 # wa
            ],
            out_specs=(
                pl.BlockSpec((block_b, Dbid), lambda i, j: (i, 0)),
                pl.BlockSpec((block_b, T_out), lambda i, j: (i, 0)),
            ),
            scratch_shapes=[pltpu.VMEM((block_b, 1), jnp.float32)],        # running max
        ),
        compiler_params=pltpu.CompilerParams(
            dimension_semantics=("parallel", "arbitrary"),
            vmem_limit_bytes=int(vmem_limit),
        ),
        cost_estimate=cost,
        interpret=interpret,
    )(vector, matrix, lens2d, wv_t, wm_t, wa)

    return rep, attn[:, :T]


def _ref_forward(vector, matrix, input_lengths, w_vec, w_mat, w_attn):
    """Pure-JAX reference (mirrors the PyTorch forward, incl. global max shift)."""
    t1 = vector @ w_vec.T
    t2 = matrix @ w_mat.T
    t3 = jnp.maximum(t1[:, None, :] + t2, 0.0)
    logits = (t3 @ w_attn.T)[..., 0]
    unnorm = jnp.exp(logits - jnp.max(logits))
    T = logits.shape[1]
    mask = (jnp.arange(T)[None, :] < input_lengths[:, None]).astype(jnp.float32)
    masked = unnorm * mask
    attn = masked / jnp.sum(masked, axis=1, keepdims=True)
    rep = jnp.sum(matrix * attn[:, :, None], axis=1)
    return rep, attn


def _check(rep, attn, rep_ref, attn_ref, lens, T):
    assert jnp.allclose(rep, rep_ref, rtol=1e-3, atol=1e-4), "representations mismatch"
    assert jnp.allclose(attn, attn_ref, rtol=1e-3, atol=2e-5), "attentions mismatch"
    assert jnp.allclose(jnp.sum(attn, axis=1), jnp.ones((attn.shape[0],)), atol=1e-4)
    invalid = jnp.where(jnp.arange(T)[None, :] >= lens[:, None], jnp.abs(attn), 0.0)
    assert float(invalid.sum()) == 0.0, "masked positions not exactly zero"


if __name__ == "__main__":
    # Module config: dim_vect=32, dim_attn=16, flag_bid=True -> dim_attn_bid=32
    dim_vect, dim_attn, flag_bid = 32, 16, True
    dim_attn_bid = dim_attn * (2 if flag_bid else 1)

    key = jax.random.PRNGKey(0)
    k1, k2, k3, k4, k5, k6, k7 = jax.random.split(key, 7)

    # PyTorch Linear weight shapes: (out_features, in_features)
    w_vec = jax.random.normal(k1, (dim_attn, dim_vect), jnp.float32) * 0.1
    w_mat = jax.random.normal(k2, (dim_attn, dim_attn_bid), jnp.float32) * 0.1
    w_attn = jax.random.normal(k3, (1, dim_attn), jnp.float32) * 0.1

    # --- config 1: small shapes from the module spec (single block, no T tiling) ---
    B1, T1 = 2, 8
    vector1 = jax.random.normal(k4, (B1, dim_vect), jnp.float32)
    matrix1 = jax.random.normal(k5, (B1, T1, dim_attn_bid), jnp.float32)
    lens1 = jnp.array([8, 5], dtype=jnp.int32)

    rep1, attn1 = attention_pair(vector1, matrix1, lens1, w_vec, w_mat, w_attn)
    jax.block_until_ready((rep1, attn1))
    rep1_ref, attn1_ref = _ref_forward(vector1, matrix1, lens1, w_vec, w_mat, w_attn)
    assert rep1.shape == (B1, dim_attn_bid) and attn1.shape == (B1, T1)
    _check(rep1, attn1, rep1_ref, attn1_ref, lens1, T1)

    # --- config 2: exercises T tiling (online softmax), batch/T ragged tails,
    #     and a multi-step batch grid for megacore sharding ---
    B2, T2 = 20, 300
    vector2 = jax.random.normal(k6, (B2, dim_vect), jnp.float32)
    matrix2 = jax.random.normal(k7, (B2, T2, dim_attn_bid), jnp.float32)
    lens2 = ((jnp.arange(B2, dtype=jnp.int32) * 37) % T2) + 1

    rep2, attn2 = attention_pair(vector2, matrix2, lens2, w_vec, w_mat, w_attn,
                                 block_b=8, block_t=128)
    jax.block_until_ready((rep2, attn2))
    rep2_ref, attn2_ref = _ref_forward(vector2, matrix2, lens2, w_vec, w_mat, w_attn)
    assert rep2.shape == (B2, dim_attn_bid) and attn2.shape == (B2, T2)
    _check(rep2, attn2, rep2_ref, attn2_ref, lens2, T2)

    print("KERNEL_OK")
</pallas_src>

<mosaic_0001>
module attributes {stable_mosaic.version = 11 : i64} {
  func.func @kernel(%arg0: i32, %arg1: i32, %arg2: memref<2x32xf32, #tpu.memory_space<vmem>>, %arg3: memref<2x8x32xf32, #tpu.memory_space<vmem>>, %arg4: memref<2x1xi32, #tpu.memory_space<vmem>>, %arg5: memref<32x16xf32, #tpu.memory_space<vmem>>, %arg6: memref<32x16xf32, #tpu.memory_space<vmem>>, %arg7: memref<1x16xf32, #tpu.memory_space<vmem>>, %arg8: memref<2x32xf32, #tpu.memory_space<vmem>>, %arg9: memref<2x8xf32, #tpu.memory_space<vmem>>, %arg10: memref<2x1xf32, #tpu.memory_space<vmem>>) attributes {dimension_semantics = [#tpu.dimension_semantics<parallel>, #tpu.dimension_semantics<arbitrary>], iteration_bounds = array<i64: 1, 1>, scalar_prefetch = 0 : i64, scratch_operands = 1 : i64, tpu.core_type = #tpu.core_type<tc>, window_params = [{transform_indices = @transform_0, window_bounds = array<i64: 2, 32>}, {transform_indices = @transform_1, window_bounds = array<i64: 2, 8, 32>}, {transform_indices = @transform_2, window_bounds = array<i64: 2, 1>}, {pipeline_mode = #tpu.pipeline_mode<synchronous>, transform_indices = @transform_3, window_bounds = array<i64: 32, 16>}, {pipeline_mode = #tpu.pipeline_mode<synchronous>, transform_indices = @transform_4, window_bounds = array<i64: 32, 16>}, {pipeline_mode = #tpu.pipeline_mode<synchronous>, transform_indices = @transform_5, window_bounds = array<i64: 1, 16>}, {transform_indices = @transform_6, window_bounds = array<i64: 2, 32>}, {transform_indices = @transform_7, window_bounds = array<i64: 2, 8>}]} {
    %c0_i32 = arith.constant 0 : i32
    %0 = arith.cmpi eq, %arg1, %c0_i32 : i32
    %1 = arith.extui %0 : i1 to i32
    %c0_i32_0 = arith.constant 0 : i32
    %2 = arith.cmpi ne, %1, %c0_i32_0 : i32
    scf.if %2 {
      %cst_33 = arith.constant -1.000000e+30 : f32
      %62 = vector.broadcast %cst_33 : f32 to vector<2x1xf32>
      %c0_34 = arith.constant 0 : index
      %c0_35 = arith.constant 0 : index
      %63 = vector.load %arg10[%c0_34, %c0_35] : memref<2x1xf32, #tpu.memory_space<vmem>>, vector<2x1xf32>
      tpu.vector_store %arg10[%c0_34, %c0_35], %62 {strides = array<i32>} : memref<2x1xf32, #tpu.memory_space<vmem>>, vector<2x1xf32>,
      %cst_36 = arith.constant 0.000000e+00 : f32
      %64 = vector.broadcast %cst_36 : f32 to vector<2x32xf32>
      %c0_37 = arith.constant 0 : index
      %c0_38 = arith.constant 0 : index
      %65 = vector.load %arg8[%c0_37, %c0_38] : memref<2x32xf32, #tpu.memory_space<vmem>>, vector<2x32xf32>
      tpu.vector_store %arg8[%c0_37, %c0_38], %64 {strides = array<i32>} : memref<2x32xf32, #tpu.memory_space<vmem>>, vector<2x32xf32>,
    } else {
    }
    %c0 = arith.constant 0 : index
    %c0_1 = arith.constant 0 : index
    %3 = vector.load %arg2[%c0, %c0_1] : memref<2x32xf32, #tpu.memory_space<vmem>>, vector<2x32xf32>
    %c0_2 = arith.constant 0 : index
    %c0_3 = arith.constant 0 : index
    %c0_4 = arith.constant 0 : index
    %4 = vector.load %arg3[%c0_2, %c0_3, %c0_4] : memref<2x8x32xf32, #tpu.memory_space<vmem>>, vector<2x8x32xf32>
    %c0_5 = arith.constant 0 : index
    %c0_6 = arith.constant 0 : index
    %5 = vector.load %arg4[%c0_5, %c0_6] : memref<2x1xi32, #tpu.memory_space<vmem>>, vector<2x1xi32>
    %c0_7 = arith.constant 0 : index
    %c0_8 = arith.constant 0 : index
    %6 = vector.load %arg5[%c0_7, %c0_8] : memref<32x16xf32, #tpu.memory_space<vmem>>, vector<32x16xf32>
    %c0_9 = arith.constant 0 : index
    %c0_10 = arith.constant 0 : index
    %7 = vector.load %arg6[%c0_9, %c0_10] : memref<32x16xf32, #tpu.memory_space<vmem>>, vector<32x16xf32>
    %c0_11 = arith.constant 0 : index
    %c0_12 = arith.constant 0 : index
    %8 = vector.load %arg7[%c0_11, %c0_12] : memref<1x16xf32, #tpu.memory_space<vmem>>, vector<1x16xf32>
    %c2_i32 = arith.constant 2 : i32
    %9 = arith.muli %arg0, %c2_i32 : i32
    %10 = tpu.iota {dimensions = array<i32: 0>} : vector<2x1xi32>
    %11 = vector.broadcast %9 : i32 to vector<2x1xi32>
    %12 = arith.addi %11, %10 : vector<2x1xi32>
    %c2_i32_13 = arith.constant 2 : i32
    %13 = vector.broadcast %c2_i32_13 : i32 to vector<2x1xi32>
    %14 = arith.cmpi slt, %12, %13 : vector<2x1xi32>
    %c8_i32 = arith.constant 8 : i32
    %15 = arith.muli %arg1, %c8_i32 : i32
    %16 = tpu.iota {dimensions = array<i32: 1>} : vector<2x8xi32>
    %17 = vector.broadcast %15 : i32 to vector<2x8xi32>
    %18 = arith.addi %17, %16 : vector<2x8xi32>
    %19 = vector.broadcast %5 : vector<2x1xi32> to vector<2x8xi32>
    %20 = arith.cmpi slt, %18, %19 : vector<2x8xi32>
    %21 = vector.broadcast %14 : vector<2x1xi1> to vector<2x8xi1>
    %22 = arith.andi %20, %21 : vector<2x8xi1>
    %cst = arith.constant dense<0.000000e+00> : vector<2x16xf32>
    %23 = tpu.matmul %3, %6, %cst {dimension_numbers = #tpu.dot_dimension_numbers<[1], [0], [0], [1], [0, 0, 1, 1], [], []>} : vector<2x32xf32>, vector<32x16xf32>, vector<2x16xf32> -> vector<2x16xf32>
    %24 = vector.shape_cast %4 : vector<2x8x32xf32> to vector<16x32xf32>
    %cst_14 = arith.constant dense<0.000000e+00> : vector<16x16xf32>
    %25 = tpu.matmul %24, %7, %cst_14 {dimension_numbers = #tpu.dot_dimension_numbers<[1], [0], [0], [1], [0, 0, 1, 1], [], []>} : vector<16x32xf32>, vector<32x16xf32>, vector<16x16xf32> -> vector<16x16xf32>
    %26 = vector.shape_cast %25 : vector<16x16xf32> to vector<2x8x16xf32>
    %27 = vector.shape_cast %23 : vector<2x16xf32> to vector<2x1x16xf32>
    %28 = vector.broadcast %27 : vector<2x1x16xf32> to vector<2x8x16xf32>
    %29 = arith.addf %28, %26 : vector<2x8x16xf32>
    %cst_15 = arith.constant 0.000000e+00 : f32
    %30 = vector.broadcast %cst_15 : f32 to vector<2x8x16xf32>
    %31 = arith.maximumf %29, %30 : vector<2x8x16xf32>
    %32 = vector.shape_cast %8 : vector<1x16xf32> to vector<1x1x16xf32>
    %33 = vector.broadcast %32 : vector<1x1x16xf32> to vector<2x8x16xf32>
    %34 = arith.mulf %31, %33 : vector<2x8x16xf32>
    %cst_16 = arith.constant dense<0.000000e+00> : vector<2x8xf32>
    %35 = vector.multi_reduction <add>, %34, %cst_16 [2] : vector<2x8x16xf32> to vector<2x8xf32>
    %cst_17 = arith.constant -1.000000e+30 : f32
    %36 = vector.broadcast %cst_17 : f32 to vector<2x8xf32>
    %37 = arith.select %22, %35, %36 : vector<2x8xi1>, vector<2x8xf32>
    %c0_18 = arith.constant 0 : index
    %c0_19 = arith.constant 0 : index
    %38 = vector.load %arg9[%c0_18, %c0_19] : memref<2x8xf32, #tpu.memory_space<vmem>>, vector<2x8xf32>
    tpu.vector_store %arg9[%c0_18, %c0_19], %37 {strides = array<i32>} : memref<2x8xf32, #tpu.memory_space<vmem>>, vector<2x8xf32>,
    %c0_20 = arith.constant 0 : index
    %c0_21 = arith.constant 0 : index
    %39 = vector.load %arg10[%c0_20, %c0_21] : memref<2x1xf32, #tpu.memory_space<vmem>>, vector<2x1xf32>
    %cst_22 = arith.constant dense<0xFF800000> : vector<2xf32>
    %40 = vector.multi_reduction <maximumf>, %37, %cst_22 [1] : vector<2x8xf32> to vector<2xf32>
    %41 = vector.shape_cast %40 : vector<2xf32> to vector<2x1xf32>
    %42 = arith.maximumf %39, %41 : vector<2x1xf32>
    %43 = arith.subf %39, %42 : vector<2x1xf32>
    %44 = math.exp %43 : vector<2x1xf32>
    %45 = vector.broadcast %42 : vector<2x1xf32> to vector<2x8xf32>
    %46 = arith.subf %37, %45 : vector<2x8xf32>
    %47 = math.exp %46 : vector<2x8xf32>
    %cst_23 = arith.constant 0.000000e+00 : f32
    %48 = vector.broadcast %cst_23 : f32 to vector<2x8xf32>
    %49 = arith.select %22, %47, %48 : vector<2x8xi1>, vector<2x8xf32>
    %50 = vector.shape_cast %49 : vector<2x8xf32> to vector<2x1x8xf32>
    "tpu.trace_start"() <{level = 10 : i32, message = "bqt,btd->bqd"}> : () -> ()
    %cst_24 = arith.constant dense<0.000000e+00> : vector<2x1x32xf32>
    %51 = tpu.matmul %50, %4, %cst_24 {dimension_numbers = #tpu.dot_dimension_numbers<[2], [1], [1], [2], [0, 0, 0, 1, 1, 2], [0], [0]>} : vector<2x1x8xf32>, vector<2x8x32xf32>, vector<2x1x32xf32> -> vector<2x1x32xf32>
    "tpu.trace_stop"() : () -> ()
    %52 = vector.shape_cast %51 : vector<2x1x32xf32> to vector<2x32xf32>
    %c0_25 = arith.constant 0 : index
    %c0_26 = arith.constant 0 : index
    %53 = vector.load %arg8[%c0_25, %c0_26] : memref<2x32xf32, #tpu.memory_space<vmem>>, vector<2x32xf32>
    %54 = vector.broadcast %44 : vector<2x1xf32> to vector<2x32xf32>
    %55 = arith.mulf %54, %53 : vector<2x32xf32>
    %56 = arith.addf %55, %52 : vector<2x32xf32>
    %c0_27 = arith.constant 0 : index
    %c0_28 = arith.constant 0 : index
    %57 = vector.load %arg8[%c0_27, %c0_28] : memref<2x32xf32, #tpu.memory_space<vmem>>, vector<2x32xf32>
    tpu.vector_store %arg8[%c0_27, %c0_28], %56 {strides = array<i32>} : memref<2x32xf32, #tpu.memory_space<vmem>>, vector<2x32xf32>,
    %c0_29 = arith.constant 0 : index
    %c0_30 = arith.constant 0 : index
    %58 = vector.load %arg10[%c0_29, %c0_30] : memref<2x1xf32, #tpu.memory_space<vmem>>, vector<2x1xf32>
    tpu.vector_store %arg10[%c0_29, %c0_30], %42 {strides = array<i32>} : memref<2x1xf32, #tpu.memory_space<vmem>>, vector<2x1xf32>,
    %c0_i32_31 = arith.constant 0 : i32
    %59 = arith.cmpi eq, %arg1, %c0_i32_31 : i32
    %60 = arith.extui %59 : i1 to i32
    %c0_i32_32 = arith.constant 0 : i32
    %61 = arith.cmpi ne, %60, %c0_i32_32 : i32
    scf.if %61 {
      %c0_33 = arith.constant 0 : index
      %c0_34 = arith.constant 0 : index
      %62 = vector.load %arg9[%c0_33, %c0_34] : memref<2x8xf32, #tpu.memory_space<vmem>>, vector<2x8xf32>
      %c0_35 = arith.constant 0 : index
      %c0_36 = arith.constant 0 : index
      %63 = vector.load %arg10[%c0_35, %c0_36] : memref<2x1xf32, #tpu.memory_space<vmem>>, vector<2x1xf32>
      %64 = tpu.iota {dimensions = array<i32: 1>} : vector<2x8xi32>
      %65 = vector.broadcast %5 : vector<2x1xi32> to vector<2x8xi32>
      %66 = arith.cmpi slt, %64, %65 : vector<2x8xi32>
      %67 = vector.broadcast %14 : vector<2x1xi1> to vector<2x8xi1>
      %68 = arith.andi %66, %67 : vector<2x8xi1>
      %69 = vector.broadcast %63 : vector<2x1xf32> to vector<2x8xf32>
      %70 = arith.subf %62, %69 : vector<2x8xf32>
      %71 = math.exp %70 : vector<2x8xf32>
      %cst_37 = arith.constant 0.000000e+00 : f32
      %72 = vector.broadcast %cst_37 : f32 to vector<2x8xf32>
      %73 = arith.select %68, %71, %72 : vector<2x8xi1>, vector<2x8xf32>
      %cst_38 = arith.constant dense<0.000000e+00> : vector<2xf32>
      %74 = vector.multi_reduction <add>, %73, %cst_38 [1] : vector<2x8xf32> to vector<2xf32>
      %75 = vector.shape_cast %74 : vector<2xf32> to vector<2x1xf32>
      %cst_39 = arith.constant 1.000000e-30 : f32
      %76 = vector.broadcast %cst_39 : f32 to vector<2x1xf32>
      %77 = arith.maximumf %75, %76 : vector<2x1xf32>
      %cst_40 = arith.constant 1.000000e+00 : f32
      %78 = vector.broadcast %cst_40 : f32 to vector<2x1xf32>
      %79 = arith.divf %78, %77 : vector<2x1xf32>
      %80 = vector.broadcast %79 : vector<2x1xf32> to vector<2x8xf32>
      %81 = arith.mulf %73, %80 : vector<2x8xf32>
      %c0_41 = arith.constant 0 : index
      %c0_42 = arith.constant 0 : index
      %82 = vector.load %arg9[%c0_41, %c0_42] : memref<2x8xf32, #tpu.memory_space<vmem>>, vector<2x8xf32>
      tpu.vector_store %arg9[%c0_41, %c0_42], %81 {strides = array<i32>} : memref<2x8xf32, #tpu.memory_space<vmem>>, vector<2x8xf32>,
      %c0_43 = arith.constant 0 : index
      %c0_44 = arith.constant 0 : index
      %83 = vector.load %arg8[%c0_43, %c0_44] : memref<2x32xf32, #tpu.memory_space<vmem>>, vector<2x32xf32>
      %84 = vector.broadcast %79 : vector<2x1xf32> to vector<2x32xf32>
      %85 = arith.mulf %83, %84 : vector<2x32xf32>
      %c0_45 = arith.constant 0 : index
      %c0_46 = arith.constant 0 : index
      %86 = vector.load %arg8[%c0_45, %c0_46] : memref<2x32xf32, #tpu.memory_space<vmem>>, vector<2x32xf32>
      tpu.vector_store %arg8[%c0_45, %c0_46], %85 {strides = array<i32>} : memref<2x32xf32, #tpu.memory_space<vmem>>, vector<2x32xf32>,
    } else {
    }
    return
  }
  func.func @transform_0(%arg0: i32, %arg1: i32) -> (i32, i32) {
    %c0_i32 = arith.constant 0 : i32
    %c0_i32_0 = arith.constant 0 : i32
    return %arg0, %c0_i32 : i32, i32
  }
  func.func @transform_1(%arg0: i32, %arg1: i32) -> (i32, i32, i32) {
    %c0_i32 = arith.constant 0 : i32
    %c0_i32_0 = arith.constant 0 : i32
    return %arg0, %arg1, %c0_i32 : i32, i32, i32
  }
  func.func @transform_2(%arg0: i32, %arg1: i32) -> (i32, i32) {
    %c0_i32 = arith.constant 0 : i32
    %c0_i32_0 = arith.constant 0 : i32
    return %arg0, %c0_i32 : i32, i32
  }
  func.func @transform_3(%arg0: i32, %arg1: i32) -> (i32, i32) {
    %c0_i32 = arith.constant 0 : i32
    %c0_i32_0 = arith.constant 0 : i32
    %c0_i32_1 = arith.constant 0 : i32
    return %c0_i32, %c0_i32_0 : i32, i32
  }
  func.func @transform_4(%arg0: i32, %arg1: i32) -> (i32, i32) {
    %c0_i32 = arith.constant 0 : i32
    %c0_i32_0 = arith.constant 0 : i32
    %c0_i32_1 = arith.constant 0 : i32
    return %c0_i32, %c0_i32_0 : i32, i32
  }
  func.func @transform_5(%arg0: i32, %arg1: i32) -> (i32, i32) {
    %c0_i32 = arith.constant 0 : i32
    %c0_i32_0 = arith.constant 0 : i32
    %c0_i32_1 = arith.constant 0 : i32
    return %c0_i32, %c0_i32_0 : i32, i32
  }
  func.func @transform_6(%arg0: i32, %arg1: i32) -> (i32, i32) {
    %c0_i32 = arith.constant 0 : i32
    %c0_i32_0 = arith.constant 0 : i32
    return %arg0, %c0_i32 : i32, i32
  }
  func.func @transform_7(%arg0: i32, %arg1: i32) -> (i32, i32) {
    %c0_i32 = arith.constant 0 : i32
    %c0_i32_0 = arith.constant 0 : i32
    return %arg0, %c0_i32 : i32, i32
  }
}

</mosaic_0001>

<bundles_post_ra>
// kernel: tpu_custom_call.1
= control target key start
LH: loop header
LB: loop body
LE: loop exit
PB: predicated region body
PF: predicated region fallthrough
CT: control target
= control target key end

     0   :  { %13 = vsyncpa [#allocation4], 0  ;;  %v679_v3 = vmov 0.0|0.0   ;;  %vm680_vm0 = vmmov 0   ;;  %v681_v8 = vmov 0.0   ;;  %s826_s0 = inlined_call_operand.vmem [shape: f32[2,32], index: 0, kind: input, shape index: {}]   ;;  %s827_s1 = inlined_call_operand.vmem [shape: f32[2,8,32], index: 1, kind: input, shape index: {}]   ;;  %s828_s2 = inlined_call_operand.vmem [shape: s32[2,1], index: 2, kind: input, shape index: {}]   ;;  %s829_s3 = inlined_call_operand.vmem [shape: f32[32,16], index: 3, kind: input, shape index: {}]   ;;  %s830_s4 = inlined_call_operand.vmem [shape: f32[32,16], index: 4, kind: input, shape index: {}]   ;;  %s831_s5 = inlined_call_operand.vmem [shape: f32[1,16], index: 5, kind: input, shape index: {}]   ;;  %s832_s6 = inlined_call_operand.hbm [shape: f32[2,32], index: 6, kind: output, shape index: {0}]   ;;  %s833_s7 = inlined_call_operand.hbm [shape: f32[2,8], index: 7, kind: output, shape index: {1}]  }
   0x1   :  { %v39_v0 = vld [vmem:[%s829_s3] sm:$0xff]  ;;  %v40_v1 = vld [vmem:[%s829_s3 + $0x8] sm:$0xff]  ;;  %599 = vmatprep.subr.bf16.mxu0 %v679_v3  ;;  %v41_v6 = vld [vmem:[%s829_s3 + $0x10] sm:$0xff]  ;;  %575 = vmatprep.mubr.msk.f32.mxu0 %vm680_vm0, %v681_v8 }
   0x2   :  { %v43_v2 = vld [vmem:[%s830_s4] sm:$0xff]  ;;  %v600_v4 = vpack.c.bf16 %v40_v1, %v39_v0  ;;  %v44_v5 = vld [vmem:[%s830_s4 + $0x8] sm:$0xff]  ;;  %v42_v7 = vld [vmem:[%s829_s3 + $0x18] sm:$0xff] }
   0x3   :  { %v605_v9 = vpack.c.bf16 %v44_v5, %v43_v2  ;;  %v45_v10 = vld [vmem:[%s830_s4 + $0x10] sm:$0xff]  ;;  %v46_v11 = vld [vmem:[%s830_s4 + $0x18] sm:$0xff]  ;;  %v603_v12 = vpack.c.bf16 %v42_v7, %v41_v6  ;;  %v36_v14 = vld [vmem:[%s827_s1] sm:$0xff] }
   0x4   :  { %601 = vmatpush3.bf16.msra.mxu0 %v600_v4  ;;  %v609_v13 = vpack.c.bf16 %v46_v11, %v45_v10 }
   0x5   :  { %14 = vsyncpa [#allocation6], 0  ;;  %602 = vmatprep.subr.bf16.mxu0 %v679_v3  ;;  %606 = vmatprep.subr.bf16.mxu1 %v605_v9  ;;  %vm66_vm1 = vcmask 261120   ;;  %v35_v15 = vld [vmem:[%s826_s0] sm:$0x3]  ;;  %v37_v16 = vld [vmem:[%s827_s1 + $0x8] sm:$0xff]  ;;  %v49_v19 = vlaneseq }
   0x6   :  { %608 = vmatpush3.bf16.msra.mxu1 %v605_v9  ;;  %586 = vmatprep.mubr.msk.f32.mxu1 %vm66_vm1, %v36_v14  ;;  %v38_v17 = vld [vmem:[%s828_s2] sm:$0x3]  ;;  %v682_v18 = vmov 0   ;;  %v683_v20 = vmov 1966171168   ;;  %vm266_vm2 = vcmask 130048  }
   0x7   :  { %610 = vmatprep.subr.bf16.mxu1 %v609_v13  ;;  %621 = vset.pattern.permute.xlu1 %v682_v18  ;;  %v223_v21 = vunpack.c.l.s4 %v683_v20  ;;  %v50_v22 = vshrl.u32 %v49_v19, 7  ;;  %v549_v37 = vld [vmem:[%s831_s5] ss:$0 sm:$0xff]  ;;  %v56_v45 = vand.u32 127, %v49_v19  ;;  %vm283_vm5 = vcmask 1041409   ;;  %s685_s5 = smov [#allocation5]  }
   0x8   :  { %604 = vmatpush3.bf16.msra.mxu0 %v603_v12  ;;  %622 = vset.pattern.permute.xlu0 %v682_v18  ;;  %vm287_vm7 = vcmask 58368   ;;  %vm31_vm8 = vcmask 1024   ;;  %v684_v56 = vmov -1e+30   ;;  %vm33_vm9 = vcmask 254976   ;;  %s534_s22 = sshll.u32 %s685_s5, 4  ;;  %s535_s22 = int_to_ptr.vmem [resolvable:$true] %s534_s22 }
   0x9   :  { %589 = vmatprep.subr.mxu0 %v681_v8  ;;  %60 = vperm.xlu1 %621, %v38_v17   ;;  %v224_v23 = vunpack.c.0.s8 %v223_v21  ;;  %v246_v28 = vsub.s32 0, %v50_v22  ;;  %v277_v48 = vsub.s32 %v56_v45, %v50_v22  ;;  %vm53_vm3 = vcmp.lt.s32.totalorder %v50_v22, 2  ;;  %32 = vst.msk [vmem:[#allocation2] sm:$0x3] %vm31_vm8, %v684_v56  ;;  %s631_s23 = scalar_lea.vmem %s535_s22, 32  ;;  %p636_p1 = scmp.lt.s32.totalorder %s535_s22, %s535_s22 }
   0xa   :  { %612 = vmatpush3.bf16.msra.mxu1 %v609_v13  ;;  %34 = vst.msk [vmem:[#allocation3] sm:$0x3] %vm33_vm9, %v681_v8  ;;  %vm329_vm10 = vcmask 64512   ;;  %p632_p0 = scmp.ne.s32.totalorder %s535_s22, %s631_s23  ;;  %p637_p2 = scmp.lt.s32.totalorder %s631_s23, %s631_s23 }
   0xb   :  { %576 = vmatmul.mubr.msk.f32.vlgmr.msra.gmra.mrb[0].mxu0 %vm66_vm1, %v35_v15  ;;  %594 = vmatprep.subr.mxu1 %v681_v8  ;;  %v771_v24 = vsub.s32 %v224_v23, %v50_v22 }
   0xc   :  { %590 = vmatpush3.msra.mxu0 %v36_v14  ;;  %591 = vmatprep.mubr.msk.f32.mxu0 %vm680_vm0, %v681_v8  ;;  %p638_p3 = por %p637_p2, %p636_p1 }
   0xd   :  { %587 = vmatmul.mubr.msk.f32.vlgmr.msra.gmra.mrb[0].mxu1 %vm66_vm1, %v37_v16 }
   0xe   :  { %595 = vmatpush3.msra.mxu1 %v37_v16  ;;  %596 = vmatprep.mubr.msk.f32.mxu1 %vm680_vm0, %v681_v8  ;;  %p639_p4 = pnand %p638_p3, %p632_p0 }
  0x10   :  { %v289_v57 = vld [vmem:[#allocation2] sm:$0x3] }
  0x88   :  { %v61_v46 = vpop.permute.xlu1 %60 }
  0x89   :  { %vm62_vm4 = vcmp.lt.s32.totalorder %v56_v45, %v61_v46 }
  0x8a   :  { %vm779_vm6 = vmand %vm62_vm4, %vm53_vm3 }
  0xde   :  { %v136_v25 = vpop.f32.mrb[0].mxu0 }
  0xdf   :  { %v228_v26 = vrot.slane %v136_v25, %v771_v24  ;;  %v577_v27 = vpop.f32.mrb[1].mxu0 }
  0xe0   :  { %v588_v29 = vpop.f32.mrb[0].mxu1 }
  0xe1   :  { %v229_v30 = vcombine.high %v228_v26, %v228_v26  ;;  %v236_v31 = vrot.slane %v228_v26, %v771_v24  ;;  %v212_v32 = vpop.f32.mrb[1].mxu1 }
  0xe3   :  { %v243_v33 = vrot.slane %v229_v30, %v771_v24  ;;  %v247_v34 = vrot.slane %v236_v31, %v246_v28 }
  0xe5   :  { %v251_v35 = vrot.slane %v243_v33, %v246_v28  ;;  %v254_v36 = vadd.f32 %v247_v34, %v212_v32 }
  0xe7   :  { %v255_v38 = vadd.f32 %v588_v29, %v251_v35  ;;  %v256_v39 = vmax.f32 %v254_v36, 0.0 }
  0xe9   :  { %v257_v40 = vmax.f32 %v255_v38, 0.0  ;;  %v264_v41 = vmul.f32 %v549_v37, %v256_v39 }
  0xeb   :  { %v267_v42 = vsel %vm266_vm2, %v264_v41, 0.0  ;;  %v265_v43 = vmul.f32 %v549_v37, %v257_v40 }
  0xec   :  { %268 = vadd.xlane.f32.xlu0 %v267_v42 }
  0xed   :  { %v270_v44 = vsel %vm266_vm2, %v265_v43, 0.0 }
  0xf0   :  { %271 = vadd.xlane.f32.xlu0 %v270_v44 }
 0x179   :  { %v269_v47 = vpop.xlane.xlu0 %268 }
 0x17a   :  { %v278_v50 = vrot.slane %v269_v47, %v277_v48 }
 0x17d   :  { %v272_v49 = vpop.xlane.xlu0 %271 }
 0x17e   :  { %v282_v51 = vrot.slane %v272_v49, %v277_v48 }
 0x180   :  { %v284_v53 = vsel %vm283_vm5, %v282_v51, %v278_v50 }
 0x181   :  { %v286_v54 = vsel %vm779_vm6, %v284_v53, -1e+30 }
 0x182   :  { %v290_v55 = vsel %vm287_vm7, %v286_v54, -inf  ;;  %288 = vst.msk [vmem:[#allocation5] sm:$0x3] %vm287_vm7, %v286_v54 }
 0x183   :  { %291 = vmax.xlane.f32.xlu1 %v290_v55 }
 0x189   :  { %v494_v3 = vld [vmem:[#allocation5] sm:$0x3] }
 0x210   :  { %v292_v58 = vpop.xlane.xlu1 %291 }
 0x211   :  { %v293_v59 = vmax.f32 %v289_v57, %v292_v58 }
 0x213   :  { %v294_v60 = vsub.f32 %v289_v57, %v293_v59  ;;  %490 = vst.msk [vmem:[#allocation2] sm:$0x3] %vm31_vm8, %v293_v59  ;;  %299 = vperm.xlu0 %622, %v293_v59  }
 0x215   :  { %v295_v61 = vmul.f32 1.442695, %v294_v60 }
 0x217   :  { %623 = vpow2.f32 %v295_v61 }
 0x21a   :  { %v495_v62 = vld [vmem:[#allocation2] sm:$0x3] }
 0x21b   :  { %500 = vperm.xlu1 %621, %v495_v62  }
 0x221   :  { %v624_v63 = vpop.eup %623 }
 0x222   :  { %477 = vperm.xlu1 %621, %v624_v63  }
 0x292   :  { %v300_v0 = vpop.permute.xlu0 %299 }
 0x293   :  { %v302_v1 = vsub.f32 %v286_v54, %v300_v0 }
 0x295   :  { %v303_v2 = vmul.f32 1.442695, %v302_v1 }
 0x297   :  { %625 = vpow2.f32 %v303_v2 }
 0x29a   :  { %v501_v4 = vpop.permute.xlu1 %500 }
 0x29b   :  { %v503_v5 = vsub.f32 %v494_v3, %v501_v4 }
 0x29d   :  { %v504_v6 = vmul.f32 1.442695, %v503_v5 }
 0x29f   :  { %627 = vpow2.f32 %v504_v6 }
 0x2a1   :  { %v626_v7 = vpop.eup %625 }
 0x2a2   :  { %v305_v9 = vsel %vm779_vm6, %v626_v7, 0.0 }
 0x2a3   :  { %v313_v10 = vrot.slane %v305_v9, %v771_v24 }
 0x2a5   :  { %v321_v8 = vrot.slane %v313_v10, %v771_v24  ;;  %v314_v11 = vcombine.high %v313_v10, %v313_v10 }
 0x2a7   :  { %592 = vmatmul.mubr.msk.f32.vlgmr.msra.gmra.mrb[2].mxu0 %vm329_vm10, %v321_v8  ;;  %v328_v12 = vrot.slane %v314_v11, %v771_v24 }
 0x2a9   :  { %v628_v13 = vpop.eup %627  ;;  %597 = vmatmul.mubr.msk.f32.vlgmr.msra.gmra.mrb[2].mxu1 %vm329_vm10, %v328_v12 }
 0x2aa   :  { %v506_v14 = vsel %vm779_vm6, %v628_v13, 0.0 }
 0x2ab   :  { %v507_v15 = vsel %vm287_vm7, %v506_v14, 0.0 }
 0x2ac   :  { %508 = vadd.xlane.f32.xlu0 %v507_v15 }
 0x339   :  { %v509_v16 = vpop.xlane.xlu0 %508 }
 0x33a   :  { %v510_v17 = vmax.f32 %v509_v16, 1e-30 }
 0x33c   :  { %629 = vrcp.f32 %v510_v17 }
 0x346   :  { %v630_v18 = vpop.eup %629 }
 0x347   :  { %v513_v19 = vmul.f32 %v630_v18, %v506_v14 }
 0x349   :  { %514 = vst.msk [vmem:[#allocation5] sm:$0x3] %vm287_vm7, %v513_v19 }
 0x34a   :  { %642 = shalt.err (!%p639_p4)
}
 0x34b   :  { %s643_s26 = scalar_lea.hbm %s833_s7, 32 }
 0x34c   :  { %p644_p5 = scmp.ne.s32.totalorder %s833_s7, %s643_s26  ;;  %p647_p6 = scmp.lt.u32.totalorder %s643_s26, %s833_s7 }
 0x34e   :  { %p649_p7 = pnand %p647_p6, %p644_p5 }
 0x350   :  { %652 = shalt.err (!%p649_p7)
}
 0x351   :  { %537 = dma.vmem_to_hbm [thread:$0]  %s535_s22, 32, %s833_s7, [#allocation6]   ;;  %v474_v21 = vld [vmem:[#allocation3] sm:$0x3]  ;;  %v478_v22 = vpop.permute.xlu1 %477 }
 0x352   :  { %v480_v27 = vmul.f32 %v478_v22, %v474_v21  ;;  %s686_s10 = smov [#allocation3]  }
 0x353   :  { %s524_s11 = sshll.u32 %s686_s10, 4  ;;  %s525_s11 = int_to_ptr.vmem [resolvable:$true] %s524_s11 }
 0x354   :  { %s653_s7 = scalar_lea.vmem %s525_s11, 32  ;;  %p658_p9 = scmp.lt.s32.totalorder %s525_s11, %s525_s11 }
 0x355   :  { %p654_p8 = scmp.ne.s32.totalorder %s525_s11, %s653_s7  ;;  %p659_p10 = scmp.lt.s32.totalorder %s653_s7, %s653_s7 }
 0x357   :  { %p660_p11 = por %p659_p10, %p658_p9 }
 0x359   :  { %p661_p12 = pnand %p660_p11, %p654_p8 }
 0x37a   :  { %v398_v20 = vpop.f32.mrb[2].mxu0 }
 0x37b   :  { %v593_v23 = vpop.f32.mrb[3].mxu0 }
 0x37c   :  { %v470_v24 = vpop.f32.mrb[2].mxu1 }
 0x37d   :  { %v483_v25 = vrot.slane %v470_v24, 7  ;;  %v598_v26 = vpop.f32.mrb[3].mxu1 }
 0x37f   :  { %v484_v28 = vsel %vm283_vm5, %v483_v25, %v398_v20 }
 0x380   :  { %v486_v29 = vadd.f32 %v484_v28, %v480_v27 }
 0x382   :  { %488 = vst.msk [vmem:[#allocation3] sm:$0x3] %vm33_vm9, %v486_v29 }
 0x389   :  { %v515_v30 = vld [vmem:[#allocation3] sm:$0x3] }
 0x38a   :  { %v516_v31 = vmul.f32 %v630_v18, %v515_v30 }
 0x38c   :  { %517 = vst.msk [vmem:[#allocation3] sm:$0x3] %vm33_vm9, %v516_v31 }
 0x38d   :  { %664 = shalt.err (!%p661_p12)
}
 0x38e   :  { %s665_s14 = scalar_lea.hbm %s832_s6, 32 }
 0x38f   :  { %p666_p13 = scmp.ne.s32.totalorder %s832_s6, %s665_s14  ;;  %p669_p0 = scmp.lt.u32.totalorder %s665_s14, %s832_s6 }
 0x391   :  { %p671_p1 = pnand %p669_p0, %p666_p13 }
 0x393   :  { %674 = shalt.err (!%p671_p1)
}
 0x394   :  { %527 = dma.vmem_to_hbm [thread:$0]  %s525_s11, 32, %s832_s6, [#allocation4]  }
 0x395   :  { %675 = dma.done.wait [#allocation4], 32  }
 0x396   :  { %676 = vsyncadd [#allocation4], 4294967264 }
 0x397   :  { %677 = dma.done.wait [#allocation6], 32  }
 0x398   :  { %678 = vsyncadd [#allocation6], 4294967264 }
 0x399   :  { %544 = vsyncpa [#allocation4], 1 }
 0x39a   :  { %545 = vsyncpa [#allocation6], 1 }

</bundles_post_ra>
